<compile_context>
chip_gen: v5e
topology: v5e:2x2
jax: 0.10.0
libtpu: 0.0.40
codegen_flags: <defaults>
</compile_context>

<pallas_src>
import jax
import jax.numpy as jnp
from jax.experimental import pallas as pl
from jax.experimental.pallas import tpu as pltpu


_VMEM_BUDGET = 36 * 1024 * 1024   # tile-fitting budget; fits v7x's 64 MiB physical VMEM
_MIN_TILES = 4                    # >= 2 * num_tensorcores (v7x) grid steps when possible


def _round_up(x, m):
    return ((x + m - 1) // m) * m


def _residual_linear_kernel(x_ref, wt_ref, b_ref, o_ref):
    # x_ref: (TM, D)   wt_ref: (D, D) already (in, out) layout   b_ref: (1, D)
    x = x_ref[...]
    # fn(x) = x @ W^T + b, computed as a plain MXU matmul against pre-transposed W.
    y = jnp.dot(x, wt_ref[...], preferred_element_type=jnp.float32)
    bias = b_ref[...]
    if bias.dtype != jnp.float32:
        bias = bias.astype(jnp.float32)
    res = x if x.dtype == jnp.float32 else x.astype(jnp.float32)
    # Residual semantics: fn(x) + x
    o_ref[...] = (y + bias + res).astype(o_ref.dtype)


def _plan_tiles(T, D, x_itemsize, w_itemsize, tm_max):
    """Pick the token tile (TM), grid size and an explicit VMEM limit."""
    D_lane = _round_up(D, 128)                      # lane-padded width Mosaic uses in VMEM
    T8 = _round_up(T, 8)
    w_vmem = _round_up(D, 8) * D_lane * w_itemsize  # one W buffer
    b_vmem = 8 * D_lane * 4
    # Per token row: double-buffered x and out tiles + ~2 live f32 temporaries.
    per_row = D_lane * (2 * x_itemsize + 2 * x_itemsize + 2 * 4)
    # Budget with 2*W so the non-Buffered(1) fallback also fits.
    avail = _VMEM_BUDGET - 2 * w_vmem - b_vmem
    tm = max(8, min(tm_max, T8, (max(avail, 0) // per_row) // 8 * 8))
    if T8 >= 2 * 8:
        # Guarantee a multi-tile grid so "parallel" can shard across TensorCores.
        tm = min(tm, max(8, _round_up(pl.cdiv(T8, _MIN_TILES), 8)))
    grid = pl.cdiv(T, tm)
    est = 2 * w_vmem + b_vmem + tm * per_row
    vmem_limit = int(min(max(1.5 * est, 32 * 1024 * 1024), 48 * 1024 * 1024))
    return tm, grid, vmem_limit


def _build_residual_call(T, D, TM, grid, out_dtype, vmem_limit, const_pipeline_mode):
    const_kw = {} if const_pipeline_mode is None else {"pipeline_mode": const_pipeline_mode}
    return pl.pallas_call(
        _residual_linear_kernel,
        out_shape=jax.ShapeDtypeStruct((T, D), out_dtype),
        grid_spec=pl.GridSpec(
            grid=(grid,),
            in_specs=[
                # x tile marches along the token axis (partial last tile is masked).
                pl.BlockSpec((TM, D), lambda i: (i, 0)),
                # W^T and b stay resident across all token tiles.
                pl.BlockSpec((D, D), lambda i: (0, 0), **const_kw),
                pl.BlockSpec((1, D), lambda i: (0, 0), **const_kw),
            ],
            out_specs=pl.BlockSpec((TM, D), lambda i: (i, 0)),
        ),
        compiler_params=pltpu.CompilerParams(
            dimension_semantics=("parallel",),
            vmem_limit_bytes=vmem_limit,
        ),
    )


def residual_linear(x, w, b, *, tm_max=1024):
    """Residual(nn.Linear(dim, dim)) forward: x @ w.T + b + x.

    x: (B, N, D);  w: (D, D) PyTorch nn.Linear weight (out, in);  b: (D,)
    """
    B, N, D = x.shape
    T = B * N

    x2 = x.reshape(T, D)
    w_t = w.T                      # one-time transpose -> (in, out) layout for the MXU
    b2 = b.reshape(1, D)

    TM, grid, vmem_limit = _plan_tiles(T, D, x.dtype.itemsize, w.dtype.itemsize, tm_max)

    try:
        call = _build_residual_call(T, D, TM, grid, x.dtype, vmem_limit, pl.Buffered(1))
        out = call(x2, w_t, b2)
    except Exception:
        # Some jax builds reject pipeline_mode on the TPU pallas_call path;
        # fall back to default double-buffering of the constant W/b blocks.
        call = _build_residual_call(T, D, TM, grid, x.dtype, vmem_limit, None)
        out = call(x2, w_t, b2)

    return out.reshape(B, N, D)


if __name__ == "__main__":
    key = jax.random.PRNGKey(0)
    kx, kw, kb = jax.random.split(key, 3)

    B, N, D = 2, 8, 32
    x = jax.random.normal(kx, (B, N, D), dtype=jnp.float32)
    # deterministic "fn" parameters (nn.Linear(dim, dim) shapes)
    w = jax.random.normal(kw, (D, D), dtype=jnp.float32) * 0.02
    b = jax.random.normal(kb, (D,), dtype=jnp.float32) * 0.02

    out = residual_linear(x, w, b)
    jax.block_until_ready(out)

    # reference check: fn(x) + x in plain JAX
    ref = jnp.einsum("bnd,ed->bne", x, w) + b + x
    assert out.shape == (B, N, D)
    assert jnp.allclose(out, ref, atol=1e-5, rtol=1e-5)

    print("KERNEL_OK")
</pallas_src>

<mosaic_0001>
module attributes {stable_mosaic.version = 11 : i64} {
  func.func @_residual_linear_kernel(%arg0: i32, %arg1: memref<8x32xf32, #tpu.memory_space<vmem>>, %arg2: memref<32x32xf32, #tpu.memory_space<vmem>>, %arg3: memref<1x32xf32, #tpu.memory_space<vmem>>, %arg4: memref<8x32xf32, #tpu.memory_space<vmem>>) attributes {dimension_semantics = [#tpu.dimension_semantics<parallel>], iteration_bounds = array<i64: 2>, scalar_prefetch = 0 : i64, scratch_operands = 0 : i64, tpu.core_type = #tpu.core_type<tc>, window_params = [{transform_indices = @transform_0, window_bounds = array<i64: 8, 32>}, {pipeline_mode = #tpu.pipeline_mode<synchronous>, transform_indices = @transform_1, window_bounds = array<i64: 32, 32>}, {pipeline_mode = #tpu.pipeline_mode<synchronous>, transform_indices = @transform_2, window_bounds = array<i64: 1, 32>}, {transform_indices = @transform_3, window_bounds = array<i64: 8, 32>}]} {
    %c0 = arith.constant 0 : index
    %c0_0 = arith.constant 0 : index
    %0 = vector.load %arg1[%c0, %c0_0] : memref<8x32xf32, #tpu.memory_space<vmem>>, vector<8x32xf32>
    %c0_1 = arith.constant 0 : index
    %c0_2 = arith.constant 0 : index
    %1 = vector.load %arg2[%c0_1, %c0_2] : memref<32x32xf32, #tpu.memory_space<vmem>>, vector<32x32xf32>
    %cst = arith.constant dense<0.000000e+00> : vector<8x32xf32>
    %2 = tpu.matmul %0, %1, %cst {dimension_numbers = #tpu.dot_dimension_numbers<[1], [0], [0], [1], [0, 0, 1, 1], [], []>} : vector<8x32xf32>, vector<32x32xf32>, vector<8x32xf32> -> vector<8x32xf32>
    %c0_3 = arith.constant 0 : index
    %c0_4 = arith.constant 0 : index
    %3 = vector.load %arg3[%c0_3, %c0_4] : memref<1x32xf32, #tpu.memory_space<vmem>>, vector<1x32xf32>
    %4 = vector.broadcast %3 : vector<1x32xf32> to vector<8x32xf32>
    %5 = arith.addf %2, %4 : vector<8x32xf32>
    %6 = arith.addf %5, %0 : vector<8x32xf32>
    %c0_5 = arith.constant 0 : index
    %c0_6 = arith.constant 0 : index
    %7 = vector.load %arg4[%c0_5, %c0_6] : memref<8x32xf32, #tpu.memory_space<vmem>>, vector<8x32xf32>
    tpu.vector_store %arg4[%c0_5, %c0_6], %6 {strides = array<i32>} : memref<8x32xf32, #tpu.memory_space<vmem>>, vector<8x32xf32>,
    return
  }
  func.func @transform_0(%arg0: i32) -> (i32, i32) {
    %c0_i32 = arith.constant 0 : i32
    %c0_i32_0 = arith.constant 0 : i32
    return %arg0, %c0_i32 : i32, i32
  }
  func.func @transform_1(%arg0: i32) -> (i32, i32) {
    %c0_i32 = arith.constant 0 : i32
    %c0_i32_0 = arith.constant 0 : i32
    %c0_i32_1 = arith.constant 0 : i32
    return %c0_i32, %c0_i32_0 : i32, i32
  }
  func.func @transform_2(%arg0: i32) -> (i32, i32) {
    %c0_i32 = arith.constant 0 : i32
    %c0_i32_0 = arith.constant 0 : i32
    %c0_i32_1 = arith.constant 0 : i32
    return %c0_i32, %c0_i32_0 : i32, i32
  }
  func.func @transform_3(%arg0: i32) -> (i32, i32) {
    %c0_i32 = arith.constant 0 : i32
    %c0_i32_0 = arith.constant 0 : i32
    return %arg0, %c0_i32 : i32, i32
  }
}

module attributes {stable_mosaic.version = 11 : i64} {
  func.func @_residual_linear_kernel(%arg0: i32, %arg1: memref<8x32xf32, #tpu.memory_space<vmem>>, %arg2: memref<32x32xf32, #tpu.memory_space<vmem>>, %arg3: memref<1x32xf32, #tpu.memory_space<vmem>>, %arg4: memref<8x32xf32, #tpu.memory_space<vmem>>) attributes {dimension_semantics = [#tpu.dimension_semantics<parallel>], iteration_bounds = array<i64: 2>, scalar_prefetch = 0 : i64, scratch_operands = 0 : i64, tpu.core_type = #tpu.core_type<tc>, window_params = [{transform_indices = @transform_0, window_bounds = array<i64: 8, 32>}, {pipeline_mode = #tpu.pipeline_mode<synchronous>, transform_indices = @transform_1, window_bounds = array<i64: 32, 32>}, {pipeline_mode = #tpu.pipeline_mode<synchronous>, transform_indices = @transform_2, window_bounds = array<i64: 1, 32>}, {transform_indices = @transform_3, window_bounds = array<i64: 8, 32>}]} {
    %c0 = arith.constant 0 : index
    %c0_0 = arith.constant 0 : index
    %0 = vector.load %arg1[%c0, %c0_0] : memref<8x32xf32, #tpu.memory_space<vmem>>, vector<8x32xf32>
    %c0_1 = arith.constant 0 : index
    %c0_2 = arith.constant 0 : index
    %1 = vector.load %arg2[%c0_1, %c0_2] : memref<32x32xf32, #tpu.memory_space<vmem>>, vector<32x32xf32>
    %cst = arith.constant dense<0.000000e+00> : vector<8x32xf32>
    %2 = tpu.matmul %0, %1, %cst {dimension_numbers = #tpu.dot_dimension_numbers<[1], [0], [0], [1], [0, 0, 1, 1], [], []>} : vector<8x32xf32>, vector<32x32xf32>, vector<8x32xf32> -> vector<8x32xf32>
    %c0_3 = arith.constant 0 : index
    %c0_4 = arith.constant 0 : index
    %3 = vector.load %arg3[%c0_3, %c0_4] : memref<1x32xf32, #tpu.memory_space<vmem>>, vector<1x32xf32>
    %4 = vector.broadcast %3 : vector<1x32xf32> to vector<8x32xf32>
    %5 = arith.addf %2, %4 : vector<8x32xf32>
    %6 = arith.addf %5, %0 : vector<8x32xf32>
    %c0_5 = arith.constant 0 : index
    %c0_6 = arith.constant 0 : index
    %7 = vector.load %arg4[%c0_5, %c0_6] : memref<8x32xf32, #tpu.memory_space<vmem>>, vector<8x32xf32>
    tpu.vector_store %arg4[%c0_5, %c0_6], %6 {strides = array<i32>} : memref<8x32xf32, #tpu.memory_space<vmem>>, vector<8x32xf32>,
    return
  }
  func.func @transform_0(%arg0: i32) -> (i32, i32) {
    %c0_i32 = arith.constant 0 : i32
    %c0_i32_0 = arith.constant 0 : i32
    return %arg0, %c0_i32 : i32, i32
  }
  func.func @transform_1(%arg0: i32) -> (i32, i32) {
    %c0_i32 = arith.constant 0 : i32
    %c0_i32_0 = arith.constant 0 : i32
    %c0_i32_1 = arith.constant 0 : i32
    return %c0_i32, %c0_i32_0 : i32, i32
  }
  func.func @transform_2(%arg0: i32) -> (i32, i32) {
    %c0_i32 = arith.constant 0 : i32
    %c0_i32_0 = arith.constant 0 : i32
    %c0_i32_1 = arith.constant 0 : i32
    return %c0_i32, %c0_i32_0 : i32, i32
  }
  func.func @transform_3(%arg0: i32) -> (i32, i32) {
    %c0_i32 = arith.constant 0 : i32
    %c0_i32_0 = arith.constant 0 : i32
    return %arg0, %c0_i32 : i32, i32
  }
}

</mosaic_0001>

<bundles_post_ra>
// kernel: tpu_custom_call.1
= control target key start
LH: loop header
LB: loop body
LE: loop exit
PB: predicated region body
PF: predicated region fallthrough
CT: control target
= control target key end

     0   :  { %8 = vsyncpa [#allocation3], 0  ;;  %s705_s0 = inlined_call_operand.hbm [shape: f32[16,32], index: 0, kind: input, shape index: {}]   ;;  %s706_s1 = inlined_call_operand.hbm [shape: f32[32,32], index: 1, kind: input, shape index: {}]   ;;  %s707_s2 = inlined_call_operand.vmem [shape: f32[1,32], index: 2, kind: input, shape index: {}]   ;;  %s708_s3 = inlined_call_operand.hbm [shape: f32[16,32], index: 3, kind: output, shape index: {}]  }
   0x1   :  { %10 = vsyncpa [#allocation3 + $0x1], 0 }
   0x2   :  { %11 = vsyncpa [#allocation6], 0 }
   0x3   :  { %12 = vsyncpa [#allocation4], 0 }
   0x4   :  { %14 = vsyncpa [#allocation4 + $0x1], 0  ;;  %s566_s12 = smov 0   ;;  %s568_s13 = smov 0  }
   0x5   :  { %s570_s14 = smov 0   ;;  %s572_s15 = smov 0  }
   0x6 LB: > { %s130_s18 = sshll.u32 %s706_s1, 4  ;;  %s590_s19 = sadd.s32 4294967295, %s541_s15   ;;  %s541_s15 = sphi %s572_s15, %s718_s15   ;;  %s537_s14 = sphi %s570_s14, %s717_s14   ;;  %s533_s13 = sphi %s568_s13, %s716_s13   ;;  %s529_s12 = sphi %s566_s12, %s715_s12   ;;  %s131_s18 = int_to_ptr.hbm [resolvable:$true] %s130_s18 }
   0x7   : > { %p337_p0 = scmp.ge.s32.totalorder %s541_s15, 1  ;;  %p41_p1 = scmp.eq.s32.totalorder %s590_s19, 0 }
   0x8   : > { %p119_p2 = scmp.lt.s32.totalorder %s541_s15, 3  ;;  %s543_s21 = smov [#allocation5]  }
   0x9   : > { %s132_s22 = sshll.u32 %s543_s21, 4  ;;  %s544_s23 = smov 128   ;;  %s133_s22 = int_to_ptr.vmem [resolvable:$true] %s132_s22 }
   0xa   : > { %p595_p3 = pnand %p337_p0, %p119_p2  ;;  %s545_s24 = smov 8  }
   0xb   : > { %s336_s25 = sadd.s32 4294967294, %s541_s15   ;;  %s606_s26 = sadd.s32 1, %s541_s15  }
   0xc   : > { %p359_p4 = pneg %p595_p3  ;;  %s27_s27 = sadd.s32 1, %s537_s14 }
   0xd   : > { %s24_s28 = ssub.s32 %s541_s15, %s606_s26  ;;  %p34_p7 = scmp.ne.s32.totalorder %s537_s14, %s533_s13 }
   0xe   : > { %p360_p6 = pnand %p359_p4, %p41_p1  ;;  %p25_p8 = scmp.eq.s32.totalorder %s24_s28, 0 }
   0xf   : > { %p35_p9 = scmp.eq.s32.totalorder %s541_s15, 0  ;;  %p40_p10 = scmp.ne.s32.totalorder %s533_s13, %s529_s12 }
  0x10   : > { %362 = dma.hbm_to_vmem [thread:$0]  (!%p360_p6), %s131_s18, 512, %s133_s22, [#allocation6], %s544_s23, %s544_s23, %s545_s24  }
  0x11   : > { %p106_p11 = scmp.eq.s32.totalorder %s590_s19, 1  ;;  %p622_p12 = por %p41_p1, %p40_p10 }
  0x12   : > { %s618_s29 = scalar_select %p25_p8, %s537_s14, %s27_s27  }
  0x13   : > { %p626_p13 = por %p106_p11, %p34_p7  ;;  %p112_p0 = scmp.eq.s32.totalorder %s336_s25, 1 }
  0x14   : > { %p36_p2 = por %p35_p9, %p34_p7  ;;  %s149_s5 = sand.u32 1, %s537_s14  }
  0x15   : > { %p631_p4 = por %p112_p0, %p40_p10  ;;  %p372_p6 = scmp.lt.s32.totalorder %s541_s15, 2 }
  0x16   : > { %s340_s7 = sshll.u32 %s149_s5, 3  ;;  %s341_s8 = sshll.u32 %s541_s15, 3 }
  0x17   : > { %s157_s11 = scalar_lea.hbm %s705_s0, %s341_s8  ;;  %s153_s17 = scalar_lea.vmem [#allocation2], %s340_s7 }
  0x18   : > { %s159_s16 = sshll.u32 %s157_s11, 4  ;;  %s161_s18 = sshll.u32 %s153_s17, 4  ;;  %s160_s16 = int_to_ptr.hbm [resolvable:$true] %s159_s16  ;;  %s162_s18 = int_to_ptr.vmem [resolvable:$true] %s161_s18 }
  0x19   : > { %p640_p8 = pnand %p372_p6, %p36_p2  ;;  %s150_s22 = scalar_lea.sflag [#allocation3], %s149_s5 }
  0x1a   : > { %s441_s23 = sshra.s32 %s160_s16, 4  ;;  %s448_s28 = scalar_lea.hbm %s705_s0, 16  ;;  %s442_s23 = int_to_ptr.hbm [resolvable:$true] %s441_s23 }
  0x1b   : > { %s443_s24 = scalar_lea.hbm %s442_s23, 8  ;;  %p445_p9 = pneg %p640_p8 }
  0x1c   : > { %p444_p7 = scmp.ne.s32.totalorder %s442_s23, %s443_s24  ;;  %p449_p0 = scmp.lt.s32.totalorder %s442_s23, %s705_s0 }
  0x1d   : > { %p450_p2 = scmp.lt.s32.totalorder %s448_s28, %s443_s24 }
  0x1e   : > { %p446_p10 = pnand %p445_p9, %p444_p7 }
  0x1f   : > { %p451_p6 = por %p450_p2, %p449_p0 }
  0x20   : > { %p447_p11 = pneg %p446_p10 }
  0x22   : > { %p452_p5 = pnand %p451_p6, %p447_p11 }
  0x24   : > { %455 = shalt.err (!%p452_p5)
}
  0x25   : > { %366 = dma.hbm_to_vmem [thread:$0]  (!%p640_p8), %s160_s16, 128, %s162_s18, %s150_s22  }
  0x26   : > { %170 = sbr.rel (%p595_p3) target bundleno = 187 (0xbb), region = 32  ;;  %s657_s5 = sand.u32 (!%p595_p3), 1, %s533_s13  }
  0x27   : > { %s343_s9 = sshll.u32 (!%p595_p3), %s657_s5, 3  ;;  %s173_s10 = scalar_lea.sflag (!%p595_p3), [#allocation3], %s657_s5 }
  0x28   : > { %s176_s11 = scalar_lea.vmem (!%p595_p3), [#allocation2], %s343_s9 }
  0x2b   : > { %516 = dma.done.wait (%p622_p12), %s173_s10, 128  }
  0x2c   : > { %518 = vsyncadd (%p622_p12), %s173_s10, 4294967168 }
  0x2d   : > { %520 = dma.done.wait (%p41_p1), [#allocation6], 512  }
  0x2e   : > { %522 = vsyncadd (%p41_p1), [#allocation6], 4294966784  ;;  %v209_v0 = vld [vmem:[#allocation5 + $0x18] sm:$0xff]  ;;  %v208_v1 = vld [vmem:[#allocation5 + $0x10] sm:$0xff]  ;;  %vm214_vm0 = vcmask 261120   ;;  %s348_s20 = sshll.u32 %s590_s19, 3 }
  0x2f   : > { %230 = vmatpush.msra.mxu0 %v209_v0  ;;  %v207_v2 = vld [vmem:[#allocation5 + $0x8] sm:$0xff]  ;;  %v206_v3 = vld [vmem:[#allocation5] sm:$0xff]  ;;  %v205_v4 = vld [vmem:[%s176_s11] sm:$0xff]  ;;  %s251_s21 = scalar_lea.hbm %s708_s3, %s348_s20  ;;  %s204_s22 = scalar_lea.vmem [#allocation7], %s343_s9 }
  0x30   : > { %v410_v5 = vld [vmem:[%s707_s2] ss:$0 sm:$0xff]  ;;  %s253_s23 = sshll.u32 %s204_s22, 4  ;;  %s255_s24 = sshll.u32 %s251_s21, 4  ;;  %s254_s23 = int_to_ptr.vmem [resolvable:$true] %s253_s23  ;;  %s256_s24 = int_to_ptr.hbm [resolvable:$true] %s255_s24 }
  0x31   : > { %231 = vmatpush.msra.mxu0 %v208_v1  ;;  %s241_s25 = scalar_lea.sflag [#allocation4], %s657_s5  ;;  %s485_s19 = sshra.s32 %s256_s24, 4  ;;  %s486_s19 = int_to_ptr.hbm [resolvable:$true] %s485_s19 }
  0x32   : > { %s487_s27 = scalar_lea.hbm %s486_s19, 8  ;;  %s491_s8 = scalar_lea.hbm %s708_s3, 16 }
  0x33   : > { %232 = vmatpush.msra.mxu0 %v207_v2  ;;  %p488_p1 = scmp.ne.s32.totalorder %s486_s19, %s487_s27  ;;  %p492_p12 = scmp.lt.s32.totalorder %s486_s19, %s708_s3 }
  0x34   : > { %p493_p8 = scmp.lt.s32.totalorder %s491_s8, %s487_s27 }
  0x35   : > { %233 = vmatpush.msra.mxu0 %v206_v3  ;;  %p489_p3 = pnand %p488_p1, %p626_p13 }
  0x36   : > { %346 = vmatmul.msk.f32.vlgmr.msra.gmra.mxu0 %vm214_vm0, %v205_v4  ;;  %p494_p7 = por %p493_p8, %p492_p12 }
  0x37   : > { %p490_p5 = pneg %p489_p3 }
  0x39   : > { %p495_p9 = pnand %p494_p7, %p490_p5 }
  0xb3   : > { %v235_v6 = vpop.f32.mrf.mxu0 }
  0xb4   : > { %v236_v7 = vadd.f32 %v410_v5, %v235_v6 }
  0xb6   : > { %v238_v8 = vadd.f32 %v236_v7, %v205_v4 }
  0xb8   : > { %239 = vst.msk [vmem:[%s204_s22] sm:$0xff] %vm214_vm0, %v238_v8 }
  0xb9   : > { %498 = shalt.err (!%p495_p9)
}
  0xba   : > { %357 = dma.vmem_to_hbm [thread:$0]  (%p626_p13), %s254_s23, 128, %s256_s24, %s241_s25  }
  0xbb PF: > { %s267_s5 = sand.u32 1, %s529_s12   ;;  %p714_p10 = scmp.ge.s32.totalorder %s541_s15, 2 }
  0xbc   : > { %s268_s11 = scalar_lea.sflag [#allocation4], %s267_s5 }
  0xbd   : > { %p368_p11 = pnand %p714_p10, %p631_p4 }
  0xbf   : > { %p369_p0 = pneg %p368_p11 }
  0xc1   : > { %524 = dma.done.wait (%p369_p0), %s268_s11, 128  }
  0xc2   : > { %526 = vsyncadd (%p369_p0), %s268_s11, 4294967168  ;;  %p17_p2 = scmp.ge.s32.totalorder %s606_s26, 4   ;;  %s715_s12 = smov %s533_s13 }
  0xc3   : > { %s716_s13 = smov %s537_s14  ;;  %s717_s14 = smov %s618_s29 }
  0xc4   : > { %s718_s15 = smov %s606_s26  ;;  %19 = sbr.rel (!%p17_p2) target bundleno = 6 (0x6), region = 81 }
  0xc9   :  { %274 = vsyncpa [#allocation3], 1 }
  0xca   :  { %276 = vsyncpa [#allocation3 + $0x1], 1 }
  0xcb   :  { %277 = vsyncpa [#allocation6], 1 }
  0xcc   :  { %278 = vsyncpa [#allocation4], 1 }
  0xcd   :  { %280 = vsyncpa [#allocation4 + $0x1], 1 }

// kernel: tpu_custom_call.1
= control target key start
LH: loop header
LB: loop body
LE: loop exit
PB: predicated region body
PF: predicated region fallthrough
CT: control target
= control target key end

     0   :  { %8 = vsyncpa [#allocation3], 0  ;;  %s705_s0 = inlined_call_operand.hbm [shape: f32[16,32], index: 0, kind: input, shape index: {}]   ;;  %s706_s1 = inlined_call_operand.hbm [shape: f32[32,32], index: 1, kind: input, shape index: {}]   ;;  %s707_s2 = inlined_call_operand.vmem [shape: f32[1,32], index: 2, kind: input, shape index: {}]   ;;  %s708_s3 = inlined_call_operand.hbm [shape: f32[16,32], index: 3, kind: output, shape index: {}]  }
   0x1   :  { %10 = vsyncpa [#allocation3 + $0x1], 0 }
   0x2   :  { %11 = vsyncpa [#allocation6], 0 }
   0x3   :  { %12 = vsyncpa [#allocation4], 0 }
   0x4   :  { %14 = vsyncpa [#allocation4 + $0x1], 0  ;;  %s566_s12 = smov 0   ;;  %s568_s13 = smov 0  }
   0x5   :  { %s570_s14 = smov 0   ;;  %s572_s15 = smov 0  }
   0x6 LB: > { %s130_s18 = sshll.u32 %s706_s1, 4  ;;  %s590_s19 = sadd.s32 4294967295, %s541_s15   ;;  %s541_s15 = sphi %s572_s15, %s718_s15   ;;  %s537_s14 = sphi %s570_s14, %s717_s14   ;;  %s533_s13 = sphi %s568_s13, %s716_s13   ;;  %s529_s12 = sphi %s566_s12, %s715_s12   ;;  %s131_s18 = int_to_ptr.hbm [resolvable:$true] %s130_s18 }
   0x7   : > { %p337_p0 = scmp.ge.s32.totalorder %s541_s15, 1  ;;  %p41_p1 = scmp.eq.s32.totalorder %s590_s19, 0 }
   0x8   : > { %p119_p2 = scmp.lt.s32.totalorder %s541_s15, 3  ;;  %s543_s21 = smov [#allocation5]  }
   0x9   : > { %s132_s22 = sshll.u32 %s543_s21, 4  ;;  %s544_s23 = smov 128   ;;  %s133_s22 = int_to_ptr.vmem [resolvable:$true] %s132_s22 }
   0xa   : > { %p595_p3 = pnand %p337_p0, %p119_p2  ;;  %s545_s24 = smov 8  }
   0xb   : > { %s336_s25 = sadd.s32 4294967294, %s541_s15   ;;  %s606_s26 = sadd.s32 1, %s541_s15  }
   0xc   : > { %p359_p4 = pneg %p595_p3  ;;  %s27_s27 = sadd.s32 1, %s537_s14 }
   0xd   : > { %s24_s28 = ssub.s32 %s541_s15, %s606_s26  ;;  %p34_p7 = scmp.ne.s32.totalorder %s537_s14, %s533_s13 }
   0xe   : > { %p360_p6 = pnand %p359_p4, %p41_p1  ;;  %p25_p8 = scmp.eq.s32.totalorder %s24_s28, 0 }
   0xf   : > { %p35_p9 = scmp.eq.s32.totalorder %s541_s15, 0  ;;  %p40_p10 = scmp.ne.s32.totalorder %s533_s13, %s529_s12 }
  0x10   : > { %362 = dma.hbm_to_vmem [thread:$0]  (!%p360_p6), %s131_s18, 512, %s133_s22, [#allocation6], %s544_s23, %s544_s23, %s545_s24  }
  0x11   : > { %p106_p11 = scmp.eq.s32.totalorder %s590_s19, 1  ;;  %p622_p12 = por %p41_p1, %p40_p10 }
  0x12   : > { %s618_s29 = scalar_select %p25_p8, %s537_s14, %s27_s27  }
  0x13   : > { %p626_p13 = por %p106_p11, %p34_p7  ;;  %p112_p0 = scmp.eq.s32.totalorder %s336_s25, 1 }
  0x14   : > { %p36_p2 = por %p35_p9, %p34_p7  ;;  %s149_s5 = sand.u32 1, %s537_s14  }
  0x15   : > { %p631_p4 = por %p112_p0, %p40_p10  ;;  %p372_p6 = scmp.lt.s32.totalorder %s541_s15, 2 }
  0x16   : > { %s340_s7 = sshll.u32 %s149_s5, 3  ;;  %s341_s8 = sshll.u32 %s541_s15, 3 }
  0x17   : > { %s157_s11 = scalar_lea.hbm %s705_s0, %s341_s8  ;;  %s153_s17 = scalar_lea.vmem [#allocation2], %s340_s7 }
  0x18   : > { %s159_s16 = sshll.u32 %s157_s11, 4  ;;  %s161_s18 = sshll.u32 %s153_s17, 4  ;;  %s160_s16 = int_to_ptr.hbm [resolvable:$true] %s159_s16  ;;  %s162_s18 = int_to_ptr.vmem [resolvable:$true] %s161_s18 }
  0x19   : > { %p640_p8 = pnand %p372_p6, %p36_p2  ;;  %s150_s22 = scalar_lea.sflag [#allocation3], %s149_s5 }
  0x1a   : > { %s441_s23 = sshra.s32 %s160_s16, 4  ;;  %s448_s28 = scalar_lea.hbm %s705_s0, 16  ;;  %s442_s23 = int_to_ptr.hbm [resolvable:$true] %s441_s23 }
  0x1b   : > { %s443_s24 = scalar_lea.hbm %s442_s23, 8  ;;  %p445_p9 = pneg %p640_p8 }
  0x1c   : > { %p444_p7 = scmp.ne.s32.totalorder %s442_s23, %s443_s24  ;;  %p449_p0 = scmp.lt.s32.totalorder %s442_s23, %s705_s0 }
  0x1d   : > { %p450_p2 = scmp.lt.s32.totalorder %s448_s28, %s443_s24 }
  0x1e   : > { %p446_p10 = pnand %p445_p9, %p444_p7 }
  0x1f   : > { %p451_p6 = por %p450_p2, %p449_p0 }
  0x20   : > { %p447_p11 = pneg %p446_p10 }
  0x22   : > { %p452_p5 = pnand %p451_p6, %p447_p11 }
  0x24   : > { %455 = shalt.err (!%p452_p5)
}
  0x25   : > { %366 = dma.hbm_to_vmem [thread:$0]  (!%p640_p8), %s160_s16, 128, %s162_s18, %s150_s22  }
  0x26   : > { %170 = sbr.rel (%p595_p3) target bundleno = 187 (0xbb), region = 32  ;;  %s657_s5 = sand.u32 (!%p595_p3), 1, %s533_s13  }
  0x27   : > { %s343_s9 = sshll.u32 (!%p595_p3), %s657_s5, 3  ;;  %s173_s10 = scalar_lea.sflag (!%p595_p3), [#allocation3], %s657_s5 }
  0x28   : > { %s176_s11 = scalar_lea.vmem (!%p595_p3), [#allocation2], %s343_s9 }
  0x2b   : > { %516 = dma.done.wait (%p622_p12), %s173_s10, 128  }
  0x2c   : > { %518 = vsyncadd (%p622_p12), %s173_s10, 4294967168 }
  0x2d   : > { %520 = dma.done.wait (%p41_p1), [#allocation6], 512  }
  0x2e   : > { %522 = vsyncadd (%p41_p1), [#allocation6], 4294966784  ;;  %v209_v0 = vld [vmem:[#allocation5 + $0x18] sm:$0xff]  ;;  %v208_v1 = vld [vmem:[#allocation5 + $0x10] sm:$0xff]  ;;  %vm214_vm0 = vcmask 261120   ;;  %s348_s20 = sshll.u32 %s590_s19, 3 }
  0x2f   : > { %230 = vmatpush.msra.mxu0 %v209_v0  ;;  %v207_v2 = vld [vmem:[#allocation5 + $0x8] sm:$0xff]  ;;  %v206_v3 = vld [vmem:[#allocation5] sm:$0xff]  ;;  %v205_v4 = vld [vmem:[%s176_s11] sm:$0xff]  ;;  %s251_s21 = scalar_lea.hbm %s708_s3, %s348_s20  ;;  %s204_s22 = scalar_lea.vmem [#allocation7], %s343_s9 }
  0x30   : > { %v410_v5 = vld [vmem:[%s707_s2] ss:$0 sm:$0xff]  ;;  %s253_s23 = sshll.u32 %s204_s22, 4  ;;  %s255_s24 = sshll.u32 %s251_s21, 4  ;;  %s254_s23 = int_to_ptr.vmem [resolvable:$true] %s253_s23  ;;  %s256_s24 = int_to_ptr.hbm [resolvable:$true] %s255_s24 }
  0x31   : > { %231 = vmatpush.msra.mxu0 %v208_v1  ;;  %s241_s25 = scalar_lea.sflag [#allocation4], %s657_s5  ;;  %s485_s19 = sshra.s32 %s256_s24, 4  ;;  %s486_s19 = int_to_ptr.hbm [resolvable:$true] %s485_s19 }
  0x32   : > { %s487_s27 = scalar_lea.hbm %s486_s19, 8  ;;  %s491_s8 = scalar_lea.hbm %s708_s3, 16 }
  0x33   : > { %232 = vmatpush.msra.mxu0 %v207_v2  ;;  %p488_p1 = scmp.ne.s32.totalorder %s486_s19, %s487_s27  ;;  %p492_p12 = scmp.lt.s32.totalorder %s486_s19, %s708_s3 }
  0x34   : > { %p493_p8 = scmp.lt.s32.totalorder %s491_s8, %s487_s27 }
  0x35   : > { %233 = vmatpush.msra.mxu0 %v206_v3  ;;  %p489_p3 = pnand %p488_p1, %p626_p13 }
  0x36   : > { %346 = vmatmul.msk.f32.vlgmr.msra.gmra.mxu0 %vm214_vm0, %v205_v4  ;;  %p494_p7 = por %p493_p8, %p492_p12 }
  0x37   : > { %p490_p5 = pneg %p489_p3 }
  0x39   : > { %p495_p9 = pnand %p494_p7, %p490_p5 }
  0xb3   : > { %v235_v6 = vpop.f32.mrf.mxu0 }
  0xb4   : > { %v236_v7 = vadd.f32 %v410_v5, %v235_v6 }
  0xb6   : > { %v238_v8 = vadd.f32 %v236_v7, %v205_v4 }
  0xb8   : > { %239 = vst.msk [vmem:[%s204_s22] sm:$0xff] %vm214_vm0, %v238_v8 }
  0xb9   : > { %498 = shalt.err (!%p495_p9)
}
  0xba   : > { %357 = dma.vmem_to_hbm [thread:$0]  (%p626_p13), %s254_s23, 128, %s256_s24, %s241_s25  }
  0xbb PF: > { %s267_s5 = sand.u32 1, %s529_s12   ;;  %p714_p10 = scmp.ge.s32.totalorder %s541_s15, 2 }
  0xbc   : > { %s268_s11 = scalar_lea.sflag [#allocation4], %s267_s5 }
  0xbd   : > { %p368_p11 = pnand %p714_p10, %p631_p4 }
  0xbf   : > { %p369_p0 = pneg %p368_p11 }
  0xc1   : > { %524 = dma.done.wait (%p369_p0), %s268_s11, 128  }
  0xc2   : > { %526 = vsyncadd (%p369_p0), %s268_s11, 4294967168  ;;  %p17_p2 = scmp.ge.s32.totalorder %s606_s26, 4   ;;  %s715_s12 = smov %s533_s13 }
  0xc3   : > { %s716_s13 = smov %s537_s14  ;;  %s717_s14 = smov %s618_s29 }
  0xc4   : > { %s718_s15 = smov %s606_s26  ;;  %19 = sbr.rel (!%p17_p2) target bundleno = 6 (0x6), region = 81 }
  0xc9   :  { %274 = vsyncpa [#allocation3], 1 }
  0xca   :  { %276 = vsyncpa [#allocation3 + $0x1], 1 }
  0xcb   :  { %277 = vsyncpa [#allocation6], 1 }
  0xcc   :  { %278 = vsyncpa [#allocation4], 1 }
  0xcd   :  { %280 = vsyncpa [#allocation4 + $0x1], 1 }

</bundles_post_ra>
